<compile_context>
chip_gen: v7x
topology: tpu7x:2x2x1
jax: 0.10.0
libtpu: 0.0.40
codegen_flags: <defaults>
</compile_context>

<pallas_src>
import jax
import jax.numpy as jnp
from jax.experimental import pallas as pl
from jax.experimental.pallas import tpu as pltpu

_LANE = 128  # TPU lane width


def _round_up(n, m):
    return ((n + m - 1) // m) * m


def _mlp_kernel(x_ref, w1_ref, b1_ref, w2_ref, b2_ref, o_ref, xpad_ref):
    """Fused Linear -> ReLU -> Linear on one batch tile.

    x_ref:  (tb, n_feature)       natural-width input tile (streamed)
    w1_ref: (f_p, h_p)            zero-padded, VMEM-resident
    b1_ref: (1, h_p)
    w2_ref: (h_p, o_p)
    b2_ref: (1, o_p)
    o_ref:  (tb, n_output)        natural-width output tile
    xpad_ref: (tb, f_p) VMEM scratch used to zero-extend x's K dim to 128 lanes.
    """
    n_feature = x_ref.shape[-1]
    n_output = o_ref.shape[-1]

    if xpad_ref.shape[-1] > n_feature:
        # Zero the padding lanes once (scratch persists across grid steps); only the
        # first n_feature lanes are rewritten each step.
        @pl.when(pl.program_id(0) == 0)
        def _():
            xpad_ref[...] = jnp.zeros_like(xpad_ref)

        xpad_ref[:, :n_feature] = x_ref[...]
        xk = xpad_ref[...]
    else:
        xk = x_ref[...]

    # hidden = relu(x @ W1 + b1)  -- bias add is a single broadcast, hoisted.
    h = jnp.dot(xk, w1_ref[...], preferred_element_type=jnp.float32)
    h = jnp.maximum(h + b1_ref[...], 0.0)

    # out = hidden @ W2 + b2; store only the logical output lanes (masked vst is
    # negligible vs. 64x fewer HBM writeback bytes).
    o = jnp.dot(h, w2_ref[...], preferred_element_type=jnp.float32)
    o = o + b2_ref[...]
    o_ref[...] = o[:, :n_output].astype(o_ref.dtype)


def net_forward(x, w1, b1, w2, b2, *, block_batch=1024):
    """Pallas forward pass of Net.

    x:  [batch, n_feature] float32
    w1: [n_feature, n_hidden], b1: [1, n_hidden]   (transpose of PyTorch's [out, in])
    w2: [n_hidden, n_output],  b2: [1, n_output]
    Returns [batch, n_output] float32.
    """
    batch, n_feature = x.shape
    n_hidden = w1.shape[1]
    n_output = w2.shape[1]
    f32 = jnp.float32

    # Pad ONLY the small, VMEM-resident weights/biases (one-time, zero-inert math).
    f_p = _round_up(n_feature, _LANE)
    h_p = _round_up(n_hidden, _LANE)
    o_p = _round_up(n_output, _LANE)

    w1_p = jnp.zeros((f_p, h_p), f32).at[:n_feature, :n_hidden].set(w1.astype(f32))
    b1_p = jnp.zeros((1, h_p), f32).at[:, :n_hidden].set(jnp.reshape(b1, (1, n_hidden)).astype(f32))
    w2_p = jnp.zeros((h_p, o_p), f32).at[:n_hidden, :n_output].set(w2.astype(f32))
    b2_p = jnp.zeros((1, o_p), f32).at[:, :n_output].set(jnp.reshape(b2, (1, n_output)).astype(f32))

    x_in = x.astype(f32)
    if batch <= block_batch:
        # Demo scale: whole problem in one grid step, no batch padding or tiling.
        tb, b_p = batch, batch
    else:
        # Large batch: big tiles (>=512 rows hits ~85% of HBM streaming roofline),
        # tb forced to a multiple of 8 to satisfy the (8,128) BlockSpec rule.
        tb = _round_up(min(block_batch, batch), 8)
        b_p = _round_up(batch, tb)
        if b_p != batch:
            x_in = jnp.zeros((b_p, n_feature), f32).at[:batch].set(x_in)
    num_steps = b_p // tb

    # Megacore sharding only pays when each TC still gets enough steps to pipeline.
    dim_sem = ("parallel",) if num_steps >= 8 else ("arbitrary",)

    # VMEM budget: resident weights/biases x1 (single-buffered), streamed x/out tiles x2
    # (double-buffered), plus the xpad scratch and hidden/out intermediates + headroom.
    bpe = 4
    resident = (f_p * h_p + h_p + h_p * o_p + o_p) * bpe
    streamed = 2 * tb * (n_feature + n_output) * bpe
    scratch_tmp = tb * (f_p + h_p + o_p) * bpe
    need = resident + streamed + scratch_tmp
    vmem_limit = int(min(56 * 1024 * 1024, max(2 * need + 4 * 1024 * 1024,
                                               16 * 1024 * 1024)))

    # Cost estimate from LOGICAL dims (not padded ones).
    cost = pl.CostEstimate(
        flops=2 * batch * (n_feature * n_hidden + n_hidden * n_output),
        transcendentals=0,
        bytes_accessed=bpe * (batch * n_feature + n_feature * n_hidden + n_hidden
                              + n_hidden * n_output + n_output + batch * n_output),
    )

    def _const_spec(shape):
        # Constant-index blocks never change across the grid -> single buffer.
        return pl.BlockSpec(shape, lambda i: (0, 0), pipeline_mode=pl.Buffered(1))

    out_p = pl.pallas_call(
        _mlp_kernel,
        out_shape=jax.ShapeDtypeStruct((b_p, n_output), f32),
        grid=(num_steps,),
        in_specs=[
            pl.BlockSpec((tb, n_feature), lambda i: (i, 0)),  # x: streamed, natural width
            _const_spec((f_p, h_p)),                          # w1: resident
            _const_spec((1, h_p)),                            # b1: resident
            _const_spec((h_p, o_p)),                          # w2: resident
            _const_spec((1, o_p)),                            # b2: resident
        ],
        out_specs=pl.BlockSpec((tb, n_output), lambda i: (i, 0)),  # natural width out
        scratch_shapes=[pltpu.VMEM((tb, f_p), f32)],
        compiler_params=pltpu.CompilerParams(
            dimension_semantics=dim_sem,
            vmem_limit_bytes=vmem_limit,
        ),
        cost_estimate=cost,
    )(x_in, w1_p, b1_p, w2_p, b2_p)

    return out_p if b_p == batch else out_p[:batch]


def init_params(key, n_feature, n_hidden, n_output):
    """PyTorch nn.Linear default init: U(-1/sqrt(fan_in), 1/sqrt(fan_in)).
    Weights stored as [in, out] (transpose of PyTorch's [out, in])."""
    k1, k2, k3, k4 = jax.random.split(key, 4)
    bound1 = 1.0 / jnp.sqrt(jnp.float32(n_feature))
    bound2 = 1.0 / jnp.sqrt(jnp.float32(n_hidden))
    w1 = jax.random.uniform(k1, (n_feature, n_hidden), jnp.float32, -bound1, bound1)
    b1 = jax.random.uniform(k2, (1, n_hidden), jnp.float32, -bound1, bound1)
    w2 = jax.random.uniform(k3, (n_hidden, n_output), jnp.float32, -bound2, bound2)
    b2 = jax.random.uniform(k4, (1, n_output), jnp.float32, -bound2, bound2)
    return w1, b1, w2, b2


if __name__ == "__main__":
    # Shapes matching the original classification demo:
    # 100 points ~ N(+2, 1) and 100 points ~ N(-2, 1), Net(2, 10, 2).
    n_per_cluster, n_feature, n_hidden, n_output = 100, 2, 10, 2
    batch = 2 * n_per_cluster

    key = jax.random.PRNGKey(0)
    kx0, kx1, kp = jax.random.split(key, 3)

    x0 = 2.0 + jax.random.normal(kx0, (n_per_cluster, n_feature), jnp.float32)
    x1 = -2.0 + jax.random.normal(kx1, (n_per_cluster, n_feature), jnp.float32)
    x = jnp.concatenate([x0, x1], axis=0)

    w1, b1, w2, b2 = init_params(kp, n_feature, n_hidden, n_output)

    # Pure-JAX reference (same math, unpadded). Tolerance covers possible MXU bf16-pass
    # default precision on either side; set precision=HIGHEST if bit-parity is required.
    ref = jnp.maximum(x @ w1 + b1, 0.0) @ w2 + b2

    # Path 1: demo scale -> single grid step, no HBM-side padding of x or the output.
    out = net_forward(x, w1, b1, w2, b2)
    jax.block_until_ready(out)
    assert out.shape == (batch, n_output)
    assert jnp.allclose(out, ref, rtol=2e-2, atol=2e-2), "single-step mismatch vs. reference"

    # Path 2: exercise the batch-tiled multi-step pipeline (tb=64, grid=4, padded rows
    # sliced away) to validate the streaming path as well.
    out_tiled = net_forward(x, w1, b1, w2, b2, block_batch=64)
    jax.block_until_ready(out_tiled)
    assert out_tiled.shape == (batch, n_output)
    assert jnp.allclose(out_tiled, ref, rtol=2e-2, atol=2e-2), "tiled mismatch vs. reference"

    print("KERNEL_OK")
</pallas_src>

<mosaic_0001>
module attributes {stable_mosaic.version = 11 : i64} {
  func.func @_mlp_kernel(%arg0: i32, %arg1: memref<200x2xf32, #tpu.memory_space<vmem>>, %arg2: memref<128x128xf32, #tpu.memory_space<vmem>>, %arg3: memref<1x128xf32, #tpu.memory_space<vmem>>, %arg4: memref<128x128xf32, #tpu.memory_space<vmem>>, %arg5: memref<1x128xf32, #tpu.memory_space<vmem>>, %arg6: memref<200x2xf32, #tpu.memory_space<vmem>>, %arg7: memref<200x128xf32, #tpu.memory_space<vmem>>) attributes {dimension_semantics = [#tpu.dimension_semantics<arbitrary>], iteration_bounds = array<i64: 1>, scalar_prefetch = 0 : i64, scratch_operands = 1 : i64, tpu.core_type = #tpu.core_type<tc>, window_params = [{transform_indices = @transform_0, window_bounds = array<i64: 200, 2>}, {pipeline_mode = #tpu.pipeline_mode<synchronous>, transform_indices = @transform_1, window_bounds = array<i64: 128, 128>}, {pipeline_mode = #tpu.pipeline_mode<synchronous>, transform_indices = @transform_2, window_bounds = array<i64: 1, 128>}, {pipeline_mode = #tpu.pipeline_mode<synchronous>, transform_indices = @transform_3, window_bounds = array<i64: 128, 128>}, {pipeline_mode = #tpu.pipeline_mode<synchronous>, transform_indices = @transform_4, window_bounds = array<i64: 1, 128>}, {transform_indices = @transform_5, window_bounds = array<i64: 200, 2>}]} {
    %c0_i32 = arith.constant 0 : i32
    %0 = arith.cmpi eq, %arg0, %c0_i32 : i32
    %1 = arith.extui %0 : i1 to i32
    %c0_i32_0 = arith.constant 0 : i32
    %2 = arith.cmpi ne, %1, %c0_i32_0 : i32
    scf.if %2 {
      %cst_18 = arith.constant 0.000000e+00 : f32
      %20 = vector.broadcast %cst_18 : f32 to vector<200x128xf32>
      %c0_19 = arith.constant 0 : index
      %c0_20 = arith.constant 0 : index
      %21 = vector.load %arg7[%c0_19, %c0_20] : memref<200x128xf32, #tpu.memory_space<vmem>>, vector<200x128xf32>
      tpu.vector_store %arg7[%c0_19, %c0_20], %20 {strides = array<i32>} : memref<200x128xf32, #tpu.memory_space<vmem>>, vector<200x128xf32>,
    } else {
    }
    %c0 = arith.constant 0 : index
    %c0_1 = arith.constant 0 : index
    %3 = vector.load %arg1[%c0, %c0_1] : memref<200x2xf32, #tpu.memory_space<vmem>>, vector<200x2xf32>
    %c0_2 = arith.constant 0 : index
    %c0_3 = arith.constant 0 : index
    %4 = vector.load %arg7[%c0_2, %c0_3] : memref<200x128xf32, #tpu.memory_space<vmem>>, vector<200x2xf32>
    tpu.vector_store %arg7[%c0_2, %c0_3], %3 {strides = array<i32>} : memref<200x128xf32, #tpu.memory_space<vmem>>, vector<200x2xf32>,
    %c0_4 = arith.constant 0 : index
    %c0_5 = arith.constant 0 : index
    %5 = vector.load %arg7[%c0_4, %c0_5] : memref<200x128xf32, #tpu.memory_space<vmem>>, vector<200x128xf32>
    %c0_6 = arith.constant 0 : index
    %c0_7 = arith.constant 0 : index
    %6 = vector.load %arg2[%c0_6, %c0_7] : memref<128x128xf32, #tpu.memory_space<vmem>>, vector<128x128xf32>
    %cst = arith.constant dense<0.000000e+00> : vector<200x128xf32>
    %7 = tpu.matmul %5, %6, %cst {dimension_numbers = #tpu.dot_dimension_numbers<[1], [0], [0], [1], [0, 0, 1, 1], [], []>} : vector<200x128xf32>, vector<128x128xf32>, vector<200x128xf32> -> vector<200x128xf32>
    %c0_8 = arith.constant 0 : index
    %c0_9 = arith.constant 0 : index
    %8 = vector.load %arg3[%c0_8, %c0_9] : memref<1x128xf32, #tpu.memory_space<vmem>>, vector<1x128xf32>
    %9 = vector.broadcast %8 : vector<1x128xf32> to vector<200x128xf32>
    %10 = arith.addf %7, %9 : vector<200x128xf32>
    %cst_10 = arith.constant 0.000000e+00 : f32
    %11 = vector.broadcast %cst_10 : f32 to vector<200x128xf32>
    %12 = arith.maximumf %10, %11 : vector<200x128xf32>
    %c0_11 = arith.constant 0 : index
    %c0_12 = arith.constant 0 : index
    %13 = vector.load %arg4[%c0_11, %c0_12] : memref<128x128xf32, #tpu.memory_space<vmem>>, vector<128x128xf32>
    %cst_13 = arith.constant dense<0.000000e+00> : vector<200x128xf32>
    %14 = tpu.matmul %12, %13, %cst_13 {dimension_numbers = #tpu.dot_dimension_numbers<[1], [0], [0], [1], [0, 0, 1, 1], [], []>} : vector<200x128xf32>, vector<128x128xf32>, vector<200x128xf32> -> vector<200x128xf32>
    %c0_14 = arith.constant 0 : index
    %c0_15 = arith.constant 0 : index
    %15 = vector.load %arg5[%c0_14, %c0_15] : memref<1x128xf32, #tpu.memory_space<vmem>>, vector<1x128xf32>
    %16 = vector.broadcast %15 : vector<1x128xf32> to vector<200x128xf32>
    %17 = arith.addf %14, %16 : vector<200x128xf32>
    %18 = vector.extract_strided_slice %17 {offsets = [0, 0], sizes = [200, 2], strides = [1, 1]} : vector<200x128xf32> to vector<200x2xf32>
    %c0_16 = arith.constant 0 : index
    %c0_17 = arith.constant 0 : index
    %19 = vector.load %arg6[%c0_16, %c0_17] : memref<200x2xf32, #tpu.memory_space<vmem>>, vector<200x2xf32>
    tpu.vector_store %arg6[%c0_16, %c0_17], %18 {strides = array<i32>} : memref<200x2xf32, #tpu.memory_space<vmem>>, vector<200x2xf32>,
    return
  }
  func.func @transform_0(%arg0: i32) -> (i32, i32) {
    %c0_i32 = arith.constant 0 : i32
    %c0_i32_0 = arith.constant 0 : i32
    return %arg0, %c0_i32 : i32, i32
  }
  func.func @transform_1(%arg0: i32) -> (i32, i32) {
    %c0_i32 = arith.constant 0 : i32
    %c0_i32_0 = arith.constant 0 : i32
    %c0_i32_1 = arith.constant 0 : i32
    return %c0_i32, %c0_i32_0 : i32, i32
  }
  func.func @transform_2(%arg0: i32) -> (i32, i32) {
    %c0_i32 = arith.constant 0 : i32
    %c0_i32_0 = arith.constant 0 : i32
    %c0_i32_1 = arith.constant 0 : i32
    return %c0_i32, %c0_i32_0 : i32, i32
  }
  func.func @transform_3(%arg0: i32) -> (i32, i32) {
    %c0_i32 = arith.constant 0 : i32
    %c0_i32_0 = arith.constant 0 : i32
    %c0_i32_1 = arith.constant 0 : i32
    return %c0_i32, %c0_i32_0 : i32, i32
  }
  func.func @transform_4(%arg0: i32) -> (i32, i32) {
    %c0_i32 = arith.constant 0 : i32
    %c0_i32_0 = arith.constant 0 : i32
    %c0_i32_1 = arith.constant 0 : i32
    return %c0_i32, %c0_i32_0 : i32, i32
  }
  func.func @transform_5(%arg0: i32) -> (i32, i32) {
    %c0_i32 = arith.constant 0 : i32
    %c0_i32_0 = arith.constant 0 : i32
    return %arg0, %c0_i32 : i32, i32
  }
}

</mosaic_0001>

<bundles_post_ra>
// kernel: tpu_custom_call.1
= control target key start
LH: loop header
LB: loop body
LE: loop exit
PB: predicated region body
PF: predicated region fallthrough
CT: control target
= control target key end

     0   :  { %10 = vsyncpa [#allocation4], 0  ;;  %s996_s18 = smov [#allocation3]   ;;  %s1493_s0 = inlined_call_operand.vmem [shape: f32[200,2], index: 0, kind: input, shape index: {}]   ;;  %s1494_s1 = inlined_call_operand.vmem [shape: f32[128,128], index: 1, kind: input, shape index: {}]   ;;  %s1495_s2 = inlined_call_operand.vmem [shape: f32[1,128], index: 2, kind: input, shape index: {}]   ;;  %s1496_s3 = inlined_call_operand.hbm [shape: f32[128,128], index: 3, kind: input, shape index: {}]   ;;  %s1497_s4 = inlined_call_operand.vmem [shape: f32[1,128], index: 4, kind: input, shape index: {}]   ;;  %s1498_s5 = inlined_call_operand.vmem [shape: f32[200,2], index: 5, kind: output, shape index: {}]  }
   0x1   :  { %s22_s19 = sshll.u32 %s996_s18, 4  ;;  %s972_s22 = scalar_lea.hbm %s1496_s3, 2048  ;;  %s23_s19 = int_to_ptr.vmem [resolvable:$true] %s22_s19 }
   0x2   :  { %p973_p0 = scmp.ne.s32.totalorder %s1496_s3, %s972_s22  ;;  %p976_p1 = scmp.lt.u32.totalorder %s972_s22, %s1496_s3 }
   0x4   :  { %p978_p2 = pnand %p976_p1, %p973_p0 }
   0x6   :  { %981 = shalt.err (!%p978_p2)
}
   0x7   :  { %s982_s27 = scalar_lea.vmem %s23_s19, 2048  ;;  %p987_p4 = scmp.lt.s32.totalorder %s23_s19, %s23_s19 }
   0x8   :  { %p983_p3 = scmp.ne.s32.totalorder %s23_s19, %s982_s27  ;;  %p988_p5 = scmp.lt.s32.totalorder %s982_s27, %s982_s27 }
   0xa   :  { %p989_p6 = por %p988_p5, %p987_p4 }
   0xc   :  { %p990_p7 = pnand %p989_p6, %p983_p3 }
   0xe   :  { %993 = shalt.err (!%p990_p7)
}
   0xf   :  { %s997_s28 = smov 128   ;;  %s998_s29 = smov 8  }
  0x10   :  { %28 = dma.hbm_to_vmem [thread:$0]  %s1496_s3, 2048, %s23_s19, [#allocation4], %s997_s28, %s997_s28, %s998_s29  }
  0x11   :  { %994 = dma.done.wait [#allocation4], 2048  }
  0x12   :  { %995 = vsyncadd [#allocation4], 4294965248  ;;  %v999_v0 = vmov 0.0|0.0   ;;  %vm1000_vm0 = vmmov 0   ;;  %v1001_v1 = vmov 0.0   ;;  %v139_v2 = vld [vmem:[%s1494_s1] sm:$0xff] }
  0x13   :  { %918 = vmatprep.subr.bf16.mxu0 %v999_v0  ;;  %736 = vmatprep.mubr.msk.f32.mxu0 %vm1000_vm0, %v1001_v1  ;;  %38 = vst [vmem:[#allocation2] sm:$0xff] %v1001_v1  ;;  %39 = vst [vmem:[#allocation2 + $0x8] sm:$0xff] %v1001_v1  ;;  %v140_v3 = vld [vmem:[%s1494_s1 + $0x8] sm:$0xff]  ;;  %v141_v4 = vld [vmem:[%s1494_s1 + $0x10] sm:$0xff]  ;;  %vm88_vm1 = vcmask 15360  }
  0x14   :  { %40 = vst [vmem:[#allocation2 + $0x10] sm:$0xff] %v1001_v1  ;;  %41 = vst [vmem:[#allocation2 + $0x18] sm:$0xff] %v1001_v1  ;;  %942 = vmatprep.subr.bf16.mxu1 %v999_v0  ;;  %843 = vmatprep.mubr.msk.f32.mxu1 %vm1000_vm0, %v1001_v1  ;;  %v919_v5 = vpack.c.bf16 %v140_v3, %v139_v2  ;;  %v142_v6 = vld [vmem:[%s1494_s1 + $0x18] sm:$0xff]  ;;  %v143_v8 = vld [vmem:[%s1494_s1 + $0x20] sm:$0xff] }
  0x15   :  { %42 = vst [vmem:[#allocation2 + $0x20] sm:$0xff] %v1001_v1  ;;  %43 = vst [vmem:[#allocation2 + $0x28] sm:$0xff] %v1001_v1  ;;  %v922_v7 = vpack.c.bf16 %v142_v6, %v141_v4  ;;  %v144_v9 = vld [vmem:[%s1494_s1 + $0x28] sm:$0xff]  ;;  %v63_v10 = vld [vmem:[%s1493_s0] sm:$0xff] }
  0x16   :  { %44 = vst [vmem:[#allocation2 + $0x30] sm:$0xff] %v1001_v1  ;;  %45 = vst [vmem:[#allocation2 + $0x38] sm:$0xff] %v1001_v1  ;;  %920 = vmatpush3.bf16.msra.mxu0 %v919_v5  ;;  %v64_v11 = vld [vmem:[%s1493_s0 + $0x8] sm:$0xff]  ;;  %v145_v12 = vld [vmem:[%s1494_s1 + $0x30] sm:$0xff]  ;;  %v925_v17 = vpack.c.bf16 %v144_v9, %v143_v8 }
  0x17   :  { %46 = vst [vmem:[#allocation2 + $0x40] sm:$0xff] %v1001_v1  ;;  %47 = vst [vmem:[#allocation2 + $0x48] sm:$0xff] %v1001_v1  ;;  %921 = vmatprep.subr.bf16.mxu0 %v999_v0  ;;  %v146_v13 = vld [vmem:[%s1494_s1 + $0x38] sm:$0xff]  ;;  %v65_v14 = vld [vmem:[%s1493_s0 + $0x10] sm:$0xff] }
  0x18   :  { %48 = vst [vmem:[#allocation2 + $0x50] sm:$0xff] %v1001_v1  ;;  %49 = vst [vmem:[#allocation2 + $0x58] sm:$0xff] %v1001_v1  ;;  %v66_v15 = vld [vmem:[%s1493_s0 + $0x18] sm:$0xff]  ;;  %v67_v16 = vld [vmem:[%s1493_s0 + $0x20] sm:$0xff]  ;;  %v928_v32 = vpack.c.bf16 %v146_v13, %v145_v12 }
  0x19   :  { %50 = vst [vmem:[#allocation2 + $0x60] sm:$0xff] %v1001_v1  ;;  %51 = vst [vmem:[#allocation2 + $0x68] sm:$0xff] %v1001_v1  ;;  %v68_v18 = vld [vmem:[%s1493_s0 + $0x28] sm:$0xff]  ;;  %v69_v19 = vld [vmem:[%s1493_s0 + $0x30] sm:$0xff] }
  0x1a   :  { %52 = vst [vmem:[#allocation2 + $0x70] sm:$0xff] %v1001_v1  ;;  %53 = vst [vmem:[#allocation2 + $0x78] sm:$0xff] %v1001_v1  ;;  %923 = vmatpush3.bf16.msra.mxu0 %v922_v7  ;;  %v70_v20 = vld [vmem:[%s1493_s0 + $0x38] sm:$0xff]  ;;  %v71_v21 = vld [vmem:[%s1493_s0 + $0x40] sm:$0xff] }
  0x1b   :  { %54 = vst [vmem:[#allocation2 + $0x80] sm:$0xff] %v1001_v1  ;;  %55 = vst [vmem:[#allocation2 + $0x88] sm:$0xff] %v1001_v1  ;;  %924 = vmatprep.subr.bf16.mxu0 %v999_v0  ;;  %v72_v22 = vld [vmem:[%s1493_s0 + $0x48] sm:$0xff]  ;;  %v73_v23 = vld [vmem:[%s1493_s0 + $0x50] sm:$0xff] }
  0x1c   :  { %56 = vst [vmem:[#allocation2 + $0x90] sm:$0xff] %v1001_v1  ;;  %57 = vst [vmem:[#allocation2 + $0x98] sm:$0xff] %v1001_v1  ;;  %v74_v24 = vld [vmem:[%s1493_s0 + $0x58] sm:$0xff]  ;;  %v75_v25 = vld [vmem:[%s1493_s0 + $0x60] sm:$0xff] }
  0x1d   :  { %58 = vst [vmem:[#allocation2 + $0xa0] sm:$0xff] %v1001_v1  ;;  %59 = vst [vmem:[#allocation2 + $0xa8] sm:$0xff] %v1001_v1  ;;  %v76_v26 = vld [vmem:[%s1493_s0 + $0x68] sm:$0xff]  ;;  %v147_v27 = vld [vmem:[%s1494_s1 + $0x40] sm:$0xff] }
  0x1e   :  { %60 = vst [vmem:[#allocation2 + $0xb0] sm:$0xff] %v1001_v1  ;;  %61 = vst [vmem:[#allocation2 + $0xb8] sm:$0xff] %v1001_v1  ;;  %v148_v28 = vld [vmem:[%s1494_s1 + $0x48] sm:$0xff]  ;;  %v77_v29 = vld [vmem:[%s1493_s0 + $0x70] sm:$0xff]  ;;  %926 = vmatpush3.bf16.msra.mxu0 %v925_v17 }
  0x1f   :  { %62 = vst [vmem:[#allocation2 + $0xc0] sm:$0xff] %v1001_v1  ;;  %89 = vst.msk [vmem:[#allocation2] sm:$0xff] %vm88_vm1, %v63_v10  ;;  %v78_v30 = vld [vmem:[%s1493_s0 + $0x78] sm:$0xff]  ;;  %v79_v31 = vld [vmem:[%s1493_s0 + $0x80] sm:$0xff]  ;;  %927 = vmatprep.subr.bf16.mxu0 %v999_v0  ;;  %v931_v40 = vpack.c.bf16 %v148_v28, %v147_v27 }
  0x20   :  { %90 = vst.msk [vmem:[#allocation2 + $0x8] sm:$0xff] %vm88_vm1, %v64_v11  ;;  %91 = vst.msk [vmem:[#allocation2 + $0x10] sm:$0xff] %vm88_vm1, %v65_v14  ;;  %v80_v33 = vld [vmem:[%s1493_s0 + $0x88] sm:$0xff]  ;;  %v81_v34 = vld [vmem:[%s1493_s0 + $0x90] sm:$0xff] }
  0x21   :  { %92 = vst.msk [vmem:[#allocation2 + $0x18] sm:$0xff] %vm88_vm1, %v66_v15  ;;  %93 = vst.msk [vmem:[#allocation2 + $0x20] sm:$0xff] %vm88_vm1, %v67_v16  ;;  %v82_v35 = vld [vmem:[%s1493_s0 + $0x98] sm:$0xff]  ;;  %v83_v36 = vld [vmem:[%s1493_s0 + $0xa0] sm:$0xff] }
  0x22   :  { %94 = vst.msk [vmem:[#allocation2 + $0x28] sm:$0xff] %vm88_vm1, %v68_v18  ;;  %95 = vst.msk [vmem:[#allocation2 + $0x30] sm:$0xff] %vm88_vm1, %v69_v19  ;;  %v84_v37 = vld [vmem:[%s1493_s0 + $0xa8] sm:$0xff]  ;;  %v85_v38 = vld [vmem:[%s1493_s0 + $0xb0] sm:$0xff]  ;;  %929 = vmatpush3.bf16.msra.mxu0 %v928_v32 }
  0x23   :  { %96 = vst.msk [vmem:[#allocation2 + $0x38] sm:$0xff] %vm88_vm1, %v70_v20  ;;  %97 = vst.msk [vmem:[#allocation2 + $0x40] sm:$0xff] %vm88_vm1, %v71_v21  ;;  %v86_v39 = vld [vmem:[%s1493_s0 + $0xb8] sm:$0xff]  ;;  %930 = vmatprep.subr.bf16.mxu0 %v999_v0  ;;  %v149_v41 = vld [vmem:[%s1494_s1 + $0x50] sm:$0xff] }
  0x24   :  { %98 = vst.msk [vmem:[#allocation2 + $0x48] sm:$0xff] %vm88_vm1, %v72_v22  ;;  %99 = vst.msk [vmem:[#allocation2 + $0x50] sm:$0xff] %vm88_vm1, %v73_v23  ;;  %v150_v42 = vld [vmem:[%s1494_s1 + $0x58] sm:$0xff]  ;;  %v151_v44 = vld [vmem:[%s1494_s1 + $0x60] sm:$0xff] }
  0x25   :  { %100 = vst.msk [vmem:[#allocation2 + $0x58] sm:$0xff] %vm88_vm1, %v74_v24  ;;  %101 = vst.msk [vmem:[#allocation2 + $0x60] sm:$0xff] %vm88_vm1, %v75_v25  ;;  %v934_v43 = vpack.c.bf16 %v150_v42, %v149_v41  ;;  %v152_v45 = vld [vmem:[%s1494_s1 + $0x68] sm:$0xff]  ;;  %v87_v46 = vld [vmem:[%s1493_s0 + $0xc0] sm:$0xff] }
  0x26   :  { %102 = vst.msk [vmem:[#allocation2 + $0x68] sm:$0xff] %vm88_vm1, %v76_v26  ;;  %103 = vst.msk [vmem:[#allocation2 + $0x70] sm:$0xff] %vm88_vm1, %v77_v29  ;;  %932 = vmatpush3.bf16.msra.mxu0 %v931_v40  ;;  %v377_v47 = vld [vmem:[#allocation3] sm:$0xff]  ;;  %v378_v48 = vld [vmem:[#allocation3 + $0x8] sm:$0xff]  ;;  %v937_v51 = vpack.c.bf16 %v152_v45, %v151_v44 }
  0x27   :  { %104 = vst.msk [vmem:[#allocation2 + $0x78] sm:$0xff] %vm88_vm1, %v78_v30  ;;  %105 = vst.msk [vmem:[#allocation2 + $0x80] sm:$0xff] %vm88_vm1, %v79_v31  ;;  %933 = vmatprep.subr.bf16.mxu0 %v999_v0  ;;  %v379_v49 = vld [vmem:[#allocation3 + $0x10] sm:$0xff]  ;;  %v380_v50 = vld [vmem:[#allocation3 + $0x18] sm:$0xff]  ;;  %v943_v52 = vpack.c.bf16 %v378_v48, %v377_v47 }
  0x28   :  { %106 = vst.msk [vmem:[#allocation2 + $0x88] sm:$0xff] %vm88_vm1, %v80_v33  ;;  %107 = vst.msk [vmem:[#allocation2 + $0x90] sm:$0xff] %vm88_vm1, %v81_v34  ;;  %v153_v53 = vld [vmem:[%s1494_s1 + $0x70] sm:$0xff]  ;;  %v154_v54 = vld [vmem:[%s1494_s1 + $0x78] sm:$0xff]  ;;  %v946_v55 = vpack.c.bf16 %v380_v50, %v379_v49 }
  0x29   :  { %108 = vst.msk [vmem:[#allocation2 + $0x98] sm:$0xff] %vm88_vm1, %v82_v35  ;;  %109 = vst.msk [vmem:[#allocation2 + $0xa0] sm:$0xff] %vm88_vm1, %v83_v36  ;;  %944 = vmatpush3.bf16.msra.mxu1 %v943_v52  ;;  %v381_v56 = vld [vmem:[#allocation3 + $0x20] sm:$0xff]  ;;  %v382_v57 = vld [vmem:[#allocation3 + $0x28] sm:$0xff]  ;;  %v940_v58 = vpack.c.bf16 %v154_v54, %v153_v53 }
  0x2a   :  { %110 = vst.msk [vmem:[#allocation2 + $0xa8] sm:$0xff] %vm88_vm1, %v84_v37  ;;  %111 = vst.msk [vmem:[#allocation2 + $0xb0] sm:$0xff] %vm88_vm1, %v85_v38  ;;  %935 = vmatpush3.bf16.msra.mxu0 %v934_v43  ;;  %945 = vmatprep.subr.bf16.mxu1 %v999_v0  ;;  %v949_v59 = vpack.c.bf16 %v382_v57, %v381_v56  ;;  %v383_v60 = vld [vmem:[#allocation3 + $0x30] sm:$0xff]  ;;  %v384_v61 = vld [vmem:[#allocation3 + $0x38] sm:$0xff] }
  0x2b   :  { %112 = vst.msk [vmem:[#allocation2 + $0xb8] sm:$0xff] %vm88_vm1, %v86_v39  ;;  %113 = vst.msk [vmem:[#allocation2 + $0xc0] sm:$0xff] %vm88_vm1, %v87_v46  ;;  %936 = vmatprep.subr.bf16.mxu0 %v999_v0  ;;  %v114_v62 = vld [vmem:[#allocation2] sm:$0xff]  ;;  %v952_v63 = vpack.c.bf16 %v384_v61, %v383_v60  ;;  %v385_v2 = vld [vmem:[#allocation3 + $0x40] sm:$0xff] }
  0x2c   :  { %v386_v3 = vld [vmem:[#allocation3 + $0x48] sm:$0xff]  ;;  %v115_v4 = vld [vmem:[#allocation2 + $0x8] sm:$0xff]  ;;  %v387_v6 = vld [vmem:[#allocation3 + $0x50] sm:$0xff] }
  0x2d   :  { %947 = vmatpush3.bf16.msra.mxu1 %v946_v55  ;;  %v955_v5 = vpack.c.bf16 %v386_v3, %v385_v2  ;;  %v388_v7 = vld [vmem:[#allocation3 + $0x58] sm:$0xff]  ;;  %v116_v8 = vld [vmem:[#allocation2 + $0x10] sm:$0xff]  ;;  %v389_v10 = vld [vmem:[#allocation3 + $0x60] sm:$0xff] }
  0x2e   :  { %938 = vmatpush3.bf16.msra.mxu0 %v937_v51  ;;  %948 = vmatprep.subr.bf16.mxu1 %v999_v0  ;;  %v958_v9 = vpack.c.bf16 %v388_v7, %v387_v6  ;;  %v390_v11 = vld [vmem:[#allocation3 + $0x68] sm:$0xff]  ;;  %v117_v12 = vld [vmem:[#allocation2 + $0x18] sm:$0xff]  ;;  %v118_v14 = vld [vmem:[#allocation2 + $0x20] sm:$0xff] }
  0x2f   :  { %939 = vmatprep.subr.bf16.mxu0 %v999_v0  ;;  %v961_v13 = vpack.c.bf16 %v390_v11, %v389_v10  ;;  %v119_v15 = vld [vmem:[#allocation2 + $0x28] sm:$0xff]  ;;  %v120_v16 = vld [vmem:[#allocation2 + $0x30] sm:$0xff]  ;;  %v121_v17 = vld [vmem:[#allocation2 + $0x38] sm:$0xff] }
  0x30   :  { %v122_v18 = vld [vmem:[#allocation2 + $0x40] sm:$0xff]  ;;  %v124_v19 = vld [vmem:[#allocation2 + $0x50] sm:$0xff]  ;;  %v125_v20 = vld [vmem:[#allocation2 + $0x58] sm:$0xff] }
  0x31   :  { %950 = vmatpush3.bf16.msra.mxu1 %v949_v59  ;;  %v126_v21 = vld [vmem:[#allocation2 + $0x60] sm:$0xff]  ;;  %v127_v22 = vld [vmem:[#allocation2 + $0x68] sm:$0xff]  ;;  %v128_v23 = vld [vmem:[#allocation2 + $0x70] sm:$0xff] }
  0x32   :  { %941 = vmatpush3.bf16.msra.mxu0 %v940_v58  ;;  %951 = vmatprep.subr.bf16.mxu1 %v999_v0  ;;  %v129_v24 = vld [vmem:[#allocation2 + $0x78] sm:$0xff]  ;;  %v130_v25 = vld [vmem:[#allocation2 + $0x80] sm:$0xff]  ;;  %v131_v26 = vld [vmem:[#allocation2 + $0x88] sm:$0xff] }
  0x33   :  { %v132_v27 = vld [vmem:[#allocation2 + $0x90] sm:$0xff]  ;;  %v133_v28 = vld [vmem:[#allocation2 + $0x98] sm:$0xff]  ;;  %v134_v29 = vld [vmem:[#allocation2 + $0xa0] sm:$0xff] }
  0x34   :  { %v135_v30 = vld [vmem:[#allocation2 + $0xa8] sm:$0xff]  ;;  %v391_v31 = vld [vmem:[#allocation3 + $0x70] sm:$0xff]  ;;  %v392_v32 = vld [vmem:[#allocation3 + $0x78] sm:$0xff] }
  0x35   :  { %737 = vmatmul.mubr.f32.vlgmr.msra.gmra.mrb[0].mxu0 %v114_v62  ;;  %953 = vmatpush3.bf16.msra.mxu1 %v952_v63  ;;  %v964_v33 = vpack.c.bf16 %v392_v32, %v391_v31  ;;  %v136_v34 = vld [vmem:[#allocation2 + $0xb0] sm:$0xff]  ;;  %v137_v35 = vld [vmem:[#allocation2 + $0xb8] sm:$0xff]  ;;  %v138_v36 = vld [vmem:[#allocation2 + $0xc0] sm:$0xff] }
  0x36   :  { %739 = vmatprep.mubr.msk.f32.mxu0 %vm1000_vm0, %v1001_v1  ;;  %954 = vmatprep.subr.bf16.mxu1 %v999_v0  ;;  %v1288_v37 = vld [vmem:[%s1495_s2] ss:$0 sm:$0xff] }
  0x39   :  { %740 = vmatmul.mubr.f32.gmra.mrb[2].mxu0 %v115_v4  ;;  %956 = vmatpush3.bf16.msra.mxu1 %v955_v5 }
  0x3a   :  { %742 = vmatprep.mubr.msk.f32.mxu0 %vm1000_vm0, %v1001_v1  ;;  %957 = vmatprep.subr.bf16.mxu1 %v999_v0 }
  0x3d   :  { %743 = vmatmul.mubr.f32.gmra.mrb[4].mxu0 %v116_v8  ;;  %959 = vmatpush3.bf16.msra.mxu1 %v958_v9 }
  0x3e   :  { %745 = vmatprep.mubr.msk.f32.mxu0 %vm1000_vm0, %v1001_v1  ;;  %960 = vmatprep.subr.bf16.mxu1 %v999_v0 }
  0x41   :  { %746 = vmatmul.mubr.f32.gmra.mrb[6].mxu0 %v117_v12  ;;  %962 = vmatpush3.bf16.msra.mxu1 %v961_v13 }
  0x42   :  { %748 = vmatprep.mubr.msk.f32.mxu0 %vm1000_vm0, %v1001_v1  ;;  %963 = vmatprep.subr.bf16.mxu1 %v999_v0  ;;  %v123_v0 = vld [vmem:[#allocation2 + $0x48] sm:$0xff] }
  0x45   :  { %749 = vmatmul.mubr.f32.gmra.mrb[8].mxu0 %v118_v14  ;;  %965 = vmatpush3.bf16.msra.mxu1 %v964_v33 }
  0x46   :  { %751 = vmatprep.mubr.msk.f32.mxu0 %vm1000_vm0, %v1001_v1 }
  0x49   :  { %752 = vmatmul.mubr.f32.gmra.mrb[10].mxu0 %v119_v15 }
  0x4a   :  { %754 = vmatprep.mubr.msk.f32.mxu0 %vm1000_vm0, %v1001_v1 }
  0x4d   :  { %755 = vmatmul.mubr.f32.gmra.mrb[12].mxu0 %v120_v16 }
  0x4e   :  { %757 = vmatprep.mubr.msk.f32.mxu0 %vm1000_vm0, %v1001_v1 }
  0x51   :  { %758 = vmatmul.mubr.f32.gmra.mrb[14].mxu0 %v121_v17 }
  0x52   :  { %760 = vmatprep.mubr.msk.f32.mxu0 %vm1000_vm0, %v1001_v1 }
  0x55   :  { %761 = vmatmul.mubr.f32.gmra.mrb[16].mxu0 %v122_v18 }
  0x56   :  { %763 = vmatprep.mubr.msk.f32.mxu0 %vm1000_vm0, %v1001_v1 }
  0x59   :  { %764 = vmatmul.mubr.f32.gmra.mrb[18].mxu0 %v123_v0 }
  0x5a   :  { %766 = vmatprep.mubr.msk.f32.mxu0 %vm1000_vm0, %v1001_v1 }
  0x5d   :  { %767 = vmatmul.mubr.f32.gmra.mrb[20].mxu0 %v124_v19 }
  0x5e   :  { %769 = vmatprep.mubr.msk.f32.mxu0 %vm1000_vm0, %v1001_v1 }
  0x61   :  { %770 = vmatmul.mubr.f32.gmra.mrb[22].mxu0 %v125_v20 }
  0x62   :  { %772 = vmatprep.mubr.msk.f32.mxu0 %vm1000_vm0, %v1001_v1 }
  0x65   :  { %773 = vmatmul.mubr.f32.gmra.mrb[24].mxu0 %v126_v21 }
  0x66   :  { %775 = vmatprep.mubr.msk.f32.mxu0 %vm1000_vm0, %v1001_v1 }
  0x69   :  { %776 = vmatmul.mubr.f32.gmra.mrb[26].mxu0 %v127_v22 }
  0x6a   :  { %778 = vmatprep.mubr.msk.f32.mxu0 %vm1000_vm0, %v1001_v1 }
  0x6d   :  { %779 = vmatmul.mubr.f32.gmra.mrb[28].mxu0 %v128_v23 }
  0x6e   :  { %781 = vmatprep.mubr.msk.f32.mxu0 %vm1000_vm0, %v1001_v1 }
  0x71   :  { %782 = vmatmul.mubr.f32.gmra.mrb[30].mxu0 %v129_v24 }
  0x72   :  { %784 = vmatprep.mubr.msk.f32.mxu0 %vm1000_vm0, %v1001_v1 }
  0x75   :  { %785 = vmatmul.mubr.f32.gmra.mrb[32].mxu0 %v130_v25 }
  0x76   :  { %787 = vmatprep.mubr.msk.f32.mxu0 %vm1000_vm0, %v1001_v1 }
  0x79   :  { %788 = vmatmul.mubr.f32.gmra.mrb[34].mxu0 %v131_v26 }
  0x7a   :  { %790 = vmatprep.mubr.msk.f32.mxu0 %vm1000_vm0, %v1001_v1 }
  0x7d   :  { %791 = vmatmul.mubr.f32.gmra.mrb[36].mxu0 %v132_v27 }
  0x7e   :  { %793 = vmatprep.mubr.msk.f32.mxu0 %vm1000_vm0, %v1001_v1 }
  0x81   :  { %794 = vmatmul.mubr.f32.gmra.mrb[38].mxu0 %v133_v28 }
  0x82   :  { %796 = vmatprep.mubr.msk.f32.mxu0 %vm1000_vm0, %v1001_v1 }
  0x85   :  { %797 = vmatmul.mubr.f32.gmra.mrb[40].mxu0 %v134_v29 }
  0x86   :  { %799 = vmatprep.mubr.msk.f32.mxu0 %vm1000_vm0, %v1001_v1 }
  0x89   :  { %800 = vmatmul.mubr.f32.gmra.mrb[42].mxu0 %v135_v30 }
  0x8a   :  { %802 = vmatprep.mubr.msk.f32.mxu0 %vm1000_vm0, %v1001_v1 }
  0x8d   :  { %803 = vmatmul.mubr.f32.gmra.mrb[44].mxu0 %v136_v34 }
  0x8e   :  { %805 = vmatprep.mubr.msk.f32.mxu0 %vm1000_vm0, %v1001_v1 }
  0x91   :  { %806 = vmatmul.mubr.f32.gmra.mrb[46].mxu0 %v137_v35 }
  0x92   :  { %808 = vmatprep.mubr.msk.f32.mxu0 %vm1000_vm0, %v1001_v1 }
  0x95   :  { %809 = vmatmul.mubr.f32.gmra.mrb[48].mxu0 %v138_v36 }
 0x108   :  { %v228_v38 = vpop.f32.mrb[0].mxu0 }
 0x109   :  { %v229_v39 = vadd.f32 %v1288_v37, %v228_v38  ;;  %v738_v40 = vpop.f32.mrb[1].mxu0 }
 0x10b   :  { %v352_v41 = vmax.f32 %v229_v39, 0.0 }
 0x10c   :  { %v233_v42 = vpop.f32.mrb[2].mxu0 }
 0x10d   :  { %v234_v43 = vadd.f32 %v1288_v37, %v233_v42  ;;  %v741_v44 = vpop.f32.mrb[3].mxu0  ;;  %844 = vmatmul.mubr.f32.vlgmr.msra.gmra.mrb[0].mxu1 %v352_v41 }
 0x10e   :  { %846 = vmatprep.mubr.msk.f32.mxu1 %vm1000_vm0, %v1001_v1 }
 0x10f   :  { %v353_v45 = vmax.f32 %v234_v43, 0.0 }
 0x110   :  { %v238_v46 = vpop.f32.mrb[4].mxu0 }
 0x111   :  { %v239_v47 = vadd.f32 %v1288_v37, %v238_v46  ;;  %v744_v48 = vpop.f32.mrb[5].mxu0  ;;  %847 = vmatmul.mubr.f32.gmra.mrb[2].mxu1 %v353_v45 }
 0x112   :  { %849 = vmatprep.mubr.msk.f32.mxu1 %vm1000_vm0, %v1001_v1 }
 0x113   :  { %v354_v49 = vmax.f32 %v239_v47, 0.0 }
 0x114   :  { %v243_v50 = vpop.f32.mrb[6].mxu0 }
 0x115   :  { %v244_v51 = vadd.f32 %v1288_v37, %v243_v50  ;;  %v747_v52 = vpop.f32.mrb[7].mxu0  ;;  %850 = vmatmul.mubr.f32.gmra.mrb[4].mxu1 %v354_v49 }
 0x116   :  { %852 = vmatprep.mubr.msk.f32.mxu1 %vm1000_vm0, %v1001_v1 }
 0x117   :  { %v355_v53 = vmax.f32 %v244_v51, 0.0 }
 0x118   :  { %v248_v54 = vpop.f32.mrb[8].mxu0 }
 0x119   :  { %v249_v55 = vadd.f32 %v1288_v37, %v248_v54  ;;  %v750_v56 = vpop.f32.mrb[9].mxu0  ;;  %853 = vmatmul.mubr.f32.gmra.mrb[6].mxu1 %v355_v53 }
 0x11a   :  { %855 = vmatprep.mubr.msk.f32.mxu1 %vm1000_vm0, %v1001_v1 }
 0x11b   :  { %v356_v57 = vmax.f32 %v249_v55, 0.0 }
 0x11c   :  { %v253_v58 = vpop.f32.mrb[10].mxu0 }
 0x11d   :  { %v254_v59 = vadd.f32 %v1288_v37, %v253_v58  ;;  %v753_v60 = vpop.f32.mrb[11].mxu0  ;;  %856 = vmatmul.mubr.f32.gmra.mrb[8].mxu1 %v356_v57 }
 0x11e   :  { %858 = vmatprep.mubr.msk.f32.mxu1 %vm1000_vm0, %v1001_v1 }
 0x11f   :  { %v357_v61 = vmax.f32 %v254_v59, 0.0 }
 0x120   :  { %v258_v62 = vpop.f32.mrb[12].mxu0 }
 0x121   :  { %v259_v63 = vadd.f32 %v1288_v37, %v258_v62  ;;  %v756_v2 = vpop.f32.mrb[13].mxu0  ;;  %859 = vmatmul.mubr.f32.gmra.mrb[10].mxu1 %v357_v61 }
 0x122   :  { %861 = vmatprep.mubr.msk.f32.mxu1 %vm1000_vm0, %v1001_v1 }
 0x123   :  { %v358_v3 = vmax.f32 %v259_v63, 0.0 }
 0x124   :  { %v263_v4 = vpop.f32.mrb[14].mxu0 }
 0x125   :  { %v264_v5 = vadd.f32 %v1288_v37, %v263_v4  ;;  %v759_v6 = vpop.f32.mrb[15].mxu0  ;;  %862 = vmatmul.mubr.f32.gmra.mrb[12].mxu1 %v358_v3 }
 0x126   :  { %864 = vmatprep.mubr.msk.f32.mxu1 %vm1000_vm0, %v1001_v1 }
 0x127   :  { %v359_v7 = vmax.f32 %v264_v5, 0.0 }
 0x128   :  { %v268_v8 = vpop.f32.mrb[16].mxu0 }
 0x129   :  { %v269_v9 = vadd.f32 %v1288_v37, %v268_v8  ;;  %v762_v10 = vpop.f32.mrb[17].mxu0  ;;  %865 = vmatmul.mubr.f32.gmra.mrb[14].mxu1 %v359_v7 }
 0x12a   :  { %867 = vmatprep.mubr.msk.f32.mxu1 %vm1000_vm0, %v1001_v1 }
 0x12b   :  { %v360_v11 = vmax.f32 %v269_v9, 0.0 }
 0x12c   :  { %v273_v12 = vpop.f32.mrb[18].mxu0 }
 0x12d   :  { %v274_v13 = vadd.f32 %v1288_v37, %v273_v12  ;;  %v765_v14 = vpop.f32.mrb[19].mxu0  ;;  %868 = vmatmul.mubr.f32.gmra.mrb[16].mxu1 %v360_v11 }
 0x12e   :  { %870 = vmatprep.mubr.msk.f32.mxu1 %vm1000_vm0, %v1001_v1  ;;  %v1366_v14 = vld [vmem:[%s1497_s4] ss:$0 sm:$0xff] }
 0x12f   :  { %v361_v15 = vmax.f32 %v274_v13, 0.0 }
 0x130   :  { %v278_v16 = vpop.f32.mrb[20].mxu0 }
 0x131   :  { %v279_v17 = vadd.f32 %v1288_v37, %v278_v16  ;;  %v768_v18 = vpop.f32.mrb[21].mxu0  ;;  %871 = vmatmul.mubr.f32.gmra.mrb[18].mxu1 %v361_v15 }
 0x132   :  { %873 = vmatprep.mubr.msk.f32.mxu1 %vm1000_vm0, %v1001_v1 }
 0x133   :  { %v362_v0 = vmax.f32 %v279_v17, 0.0 }
 0x134   :  { %v283_v19 = vpop.f32.mrb[22].mxu0 }
 0x135   :  { %v284_v20 = vadd.f32 %v1288_v37, %v283_v19  ;;  %v771_v21 = vpop.f32.mrb[23].mxu0  ;;  %874 = vmatmul.mubr.f32.gmra.mrb[20].mxu1 %v362_v0 }
 0x136   :  { %876 = vmatprep.mubr.msk.f32.mxu1 %vm1000_vm0, %v1001_v1 }
 0x137   :  { %v363_v22 = vmax.f32 %v284_v20, 0.0 }
 0x138   :  { %v288_v23 = vpop.f32.mrb[24].mxu0 }
 0x139   :  { %v289_v24 = vadd.f32 %v1288_v37, %v288_v23  ;;  %v774_v25 = vpop.f32.mrb[25].mxu0  ;;  %877 = vmatmul.mubr.f32.gmra.mrb[22].mxu1 %v363_v22 }
 0x13a   :  { %879 = vmatprep.mubr.msk.f32.mxu1 %vm1000_vm0, %v1001_v1 }
 0x13b   :  { %v364_v26 = vmax.f32 %v289_v24, 0.0 }
 0x13c   :  { %v293_v27 = vpop.f32.mrb[26].mxu0 }
 0x13d   :  { %v294_v28 = vadd.f32 %v1288_v37, %v293_v27  ;;  %v777_v29 = vpop.f32.mrb[27].mxu0  ;;  %880 = vmatmul.mubr.f32.gmra.mrb[24].mxu1 %v364_v26 }
 0x13e   :  { %882 = vmatprep.mubr.msk.f32.mxu1 %vm1000_vm0, %v1001_v1 }
 0x13f   :  { %v365_v30 = vmax.f32 %v294_v28, 0.0 }
 0x140   :  { %v298_v31 = vpop.f32.mrb[28].mxu0 }
 0x141   :  { %v299_v32 = vadd.f32 %v1288_v37, %v298_v31  ;;  %v780_v33 = vpop.f32.mrb[29].mxu0  ;;  %883 = vmatmul.mubr.f32.gmra.mrb[26].mxu1 %v365_v30 }
 0x142   :  { %885 = vmatprep.mubr.msk.f32.mxu1 %vm1000_vm0, %v1001_v1 }
 0x143   :  { %v366_v34 = vmax.f32 %v299_v32, 0.0 }
 0x144   :  { %v303_v35 = vpop.f32.mrb[30].mxu0 }
 0x145   :  { %v304_v36 = vadd.f32 %v1288_v37, %v303_v35  ;;  %v783_v38 = vpop.f32.mrb[31].mxu0  ;;  %886 = vmatmul.mubr.f32.gmra.mrb[28].mxu1 %v366_v34 }
 0x146   :  { %888 = vmatprep.mubr.msk.f32.mxu1 %vm1000_vm0, %v1001_v1 }
 0x147   :  { %v367_v39 = vmax.f32 %v304_v36, 0.0 }
 0x148   :  { %v308_v40 = vpop.f32.mrb[32].mxu0 }
 0x149   :  { %v309_v41 = vadd.f32 %v1288_v37, %v308_v40  ;;  %v786_v42 = vpop.f32.mrb[33].mxu0  ;;  %889 = vmatmul.mubr.f32.gmra.mrb[30].mxu1 %v367_v39 }
 0x14a   :  { %891 = vmatprep.mubr.msk.f32.mxu1 %vm1000_vm0, %v1001_v1 }
 0x14b   :  { %v368_v43 = vmax.f32 %v309_v41, 0.0 }
 0x14c   :  { %v313_v44 = vpop.f32.mrb[34].mxu0 }
 0x14d   :  { %v314_v45 = vadd.f32 %v1288_v37, %v313_v44  ;;  %v789_v46 = vpop.f32.mrb[35].mxu0  ;;  %892 = vmatmul.mubr.f32.gmra.mrb[32].mxu1 %v368_v43 }
 0x14e   :  { %894 = vmatprep.mubr.msk.f32.mxu1 %vm1000_vm0, %v1001_v1 }
 0x14f   :  { %v369_v47 = vmax.f32 %v314_v45, 0.0 }
 0x150   :  { %v318_v48 = vpop.f32.mrb[36].mxu0 }
 0x151   :  { %v319_v49 = vadd.f32 %v1288_v37, %v318_v48  ;;  %v792_v50 = vpop.f32.mrb[37].mxu0  ;;  %895 = vmatmul.mubr.f32.gmra.mrb[34].mxu1 %v369_v47 }
 0x152   :  { %897 = vmatprep.mubr.msk.f32.mxu1 %vm1000_vm0, %v1001_v1 }
 0x153   :  { %v370_v51 = vmax.f32 %v319_v49, 0.0 }
 0x154   :  { %v323_v52 = vpop.f32.mrb[38].mxu0 }
 0x155   :  { %v324_v53 = vadd.f32 %v1288_v37, %v323_v52  ;;  %v795_v54 = vpop.f32.mrb[39].mxu0  ;;  %898 = vmatmul.mubr.f32.gmra.mrb[36].mxu1 %v370_v51 }
 0x156   :  { %900 = vmatprep.mubr.msk.f32.mxu1 %vm1000_vm0, %v1001_v1 }
 0x157   :  { %v371_v55 = vmax.f32 %v324_v53, 0.0 }
 0x158   :  { %v328_v56 = vpop.f32.mrb[40].mxu0 }
 0x159   :  { %v329_v57 = vadd.f32 %v1288_v37, %v328_v56  ;;  %v798_v58 = vpop.f32.mrb[41].mxu0  ;;  %901 = vmatmul.mubr.f32.gmra.mrb[38].mxu1 %v371_v55 }
 0x15a   :  { %903 = vmatprep.mubr.msk.f32.mxu1 %vm1000_vm0, %v1001_v1 }
 0x15b   :  { %v372_v59 = vmax.f32 %v329_v57, 0.0 }
 0x15c   :  { %v333_v60 = vpop.f32.mrb[42].mxu0 }
 0x15d   :  { %v334_v61 = vadd.f32 %v1288_v37, %v333_v60  ;;  %v801_v62 = vpop.f32.mrb[43].mxu0  ;;  %904 = vmatmul.mubr.f32.gmra.mrb[40].mxu1 %v372_v59 }
 0x15e   :  { %906 = vmatprep.mubr.msk.f32.mxu1 %vm1000_vm0, %v1001_v1 }
 0x15f   :  { %v373_v63 = vmax.f32 %v334_v61, 0.0 }
 0x160   :  { %v338_v2 = vpop.f32.mrb[44].mxu0 }
 0x161   :  { %v339_v3 = vadd.f32 %v1288_v37, %v338_v2  ;;  %v804_v4 = vpop.f32.mrb[45].mxu0  ;;  %907 = vmatmul.mubr.f32.gmra.mrb[42].mxu1 %v373_v63 }
 0x162   :  { %909 = vmatprep.mubr.msk.f32.mxu1 %vm1000_vm0, %v1001_v1 }
 0x163   :  { %v374_v5 = vmax.f32 %v339_v3, 0.0 }
 0x164   :  { %v343_v6 = vpop.f32.mrb[46].mxu0 }
 0x165   :  { %v344_v7 = vadd.f32 %v1288_v37, %v343_v6  ;;  %v807_v8 = vpop.f32.mrb[47].mxu0  ;;  %910 = vmatmul.mubr.f32.gmra.mrb[44].mxu1 %v374_v5 }
 0x166   :  { %912 = vmatprep.mubr.msk.f32.mxu1 %vm1000_vm0, %v1001_v1 }
 0x167   :  { %v375_v9 = vmax.f32 %v344_v7, 0.0 }
 0x168   :  { %v348_v10 = vpop.f32.mrb[48].mxu0 }
 0x169   :  { %v349_v11 = vadd.f32 %v1288_v37, %v348_v10  ;;  %v810_v12 = vpop.f32.mrb[49].mxu0  ;;  %913 = vmatmul.mubr.f32.gmra.mrb[46].mxu1 %v375_v9 }
 0x16a   :  { %915 = vmatprep.mubr.msk.f32.mxu1 %vm1000_vm0, %v1001_v1 }
 0x16b   :  { %v376_v13 = vmax.f32 %v349_v11, 0.0 }
 0x16d   :  { %916 = vmatmul.mubr.f32.gmra.mrb[48].mxu1 %v376_v13 }
 0x1e0   :  { %v466_v15 = vpop.f32.mrb[0].mxu1 }
 0x1e1   :  { %v467_v16 = vadd.f32 %v1366_v14, %v466_v15  ;;  %v845_v17 = vpop.f32.mrb[1].mxu1 }
 0x1e3   :  { %590 = vst.msk [vmem:[%s1498_s5] sm:$0xff] %vm88_vm1, %v467_v16 }
 0x1e4   :  { %v471_v37 = vpop.f32.mrb[2].mxu1 }
 0x1e5   :  { %v472_v18 = vadd.f32 %v1366_v14, %v471_v37  ;;  %v848_v1 = vpop.f32.mrb[3].mxu1 }
 0x1e7   :  { %591 = vst.msk [vmem:[%s1498_s5 + $0x8] sm:$0xff] %vm88_vm1, %v472_v18 }
 0x1e8   :  { %v476_v0 = vpop.f32.mrb[4].mxu1 }
 0x1e9   :  { %v477_v19 = vadd.f32 %v1366_v14, %v476_v0  ;;  %v851_v20 = vpop.f32.mrb[5].mxu1 }
 0x1eb   :  { %592 = vst.msk [vmem:[%s1498_s5 + $0x10] sm:$0xff] %vm88_vm1, %v477_v19 }
 0x1ec   :  { %v481_v21 = vpop.f32.mrb[6].mxu1 }
 0x1ed   :  { %v482_v22 = vadd.f32 %v1366_v14, %v481_v21  ;;  %v854_v23 = vpop.f32.mrb[7].mxu1 }
 0x1ef   :  { %593 = vst.msk [vmem:[%s1498_s5 + $0x18] sm:$0xff] %vm88_vm1, %v482_v22 }
 0x1f0   :  { %v486_v24 = vpop.f32.mrb[8].mxu1 }
 0x1f1   :  { %v487_v25 = vadd.f32 %v1366_v14, %v486_v24  ;;  %v857_v26 = vpop.f32.mrb[9].mxu1 }
 0x1f3   :  { %594 = vst.msk [vmem:[%s1498_s5 + $0x20] sm:$0xff] %vm88_vm1, %v487_v25 }
 0x1f4   :  { %v491_v27 = vpop.f32.mrb[10].mxu1 }
 0x1f5   :  { %v492_v28 = vadd.f32 %v1366_v14, %v491_v27  ;;  %v860_v29 = vpop.f32.mrb[11].mxu1 }
 0x1f7   :  { %595 = vst.msk [vmem:[%s1498_s5 + $0x28] sm:$0xff] %vm88_vm1, %v492_v28 }
 0x1f8   :  { %v496_v30 = vpop.f32.mrb[12].mxu1 }
 0x1f9   :  { %v497_v31 = vadd.f32 %v1366_v14, %v496_v30  ;;  %v863_v32 = vpop.f32.mrb[13].mxu1 }
 0x1fb   :  { %596 = vst.msk [vmem:[%s1498_s5 + $0x30] sm:$0xff] %vm88_vm1, %v497_v31 }
 0x1fc   :  { %v501_v33 = vpop.f32.mrb[14].mxu1 }
 0x1fd   :  { %v502_v34 = vadd.f32 %v1366_v14, %v501_v33  ;;  %v866_v35 = vpop.f32.mrb[15].mxu1 }
 0x1ff   :  { %597 = vst.msk [vmem:[%s1498_s5 + $0x38] sm:$0xff] %vm88_vm1, %v502_v34 }
 0x200   :  { %v506_v36 = vpop.f32.mrb[16].mxu1 }
 0x201   :  { %v507_v38 = vadd.f32 %v1366_v14, %v506_v36  ;;  %v869_v39 = vpop.f32.mrb[17].mxu1 }
 0x203   :  { %598 = vst.msk [vmem:[%s1498_s5 + $0x40] sm:$0xff] %vm88_vm1, %v507_v38 }
 0x204   :  { %v511_v40 = vpop.f32.mrb[18].mxu1 }
 0x205   :  { %v512_v41 = vadd.f32 %v1366_v14, %v511_v40  ;;  %v872_v42 = vpop.f32.mrb[19].mxu1 }
 0x207   :  { %599 = vst.msk [vmem:[%s1498_s5 + $0x48] sm:$0xff] %vm88_vm1, %v512_v41 }
 0x208   :  { %v516_v43 = vpop.f32.mrb[20].mxu1 }
 0x209   :  { %v517_v44 = vadd.f32 %v1366_v14, %v516_v43  ;;  %v875_v45 = vpop.f32.mrb[21].mxu1 }
 0x20b   :  { %600 = vst.msk [vmem:[%s1498_s5 + $0x50] sm:$0xff] %vm88_vm1, %v517_v44 }
 0x20c   :  { %v521_v46 = vpop.f32.mrb[22].mxu1 }
 0x20d   :  { %v522_v47 = vadd.f32 %v1366_v14, %v521_v46  ;;  %v878_v48 = vpop.f32.mrb[23].mxu1 }
 0x20f   :  { %601 = vst.msk [vmem:[%s1498_s5 + $0x58] sm:$0xff] %vm88_vm1, %v522_v47 }
 0x210   :  { %v526_v49 = vpop.f32.mrb[24].mxu1 }
 0x211   :  { %v527_v50 = vadd.f32 %v1366_v14, %v526_v49  ;;  %v881_v51 = vpop.f32.mrb[25].mxu1 }
 0x213   :  { %602 = vst.msk [vmem:[%s1498_s5 + $0x60] sm:$0xff] %vm88_vm1, %v527_v50 }
 0x214   :  { %v531_v52 = vpop.f32.mrb[26].mxu1 }
 0x215   :  { %v532_v53 = vadd.f32 %v1366_v14, %v531_v52  ;;  %v884_v54 = vpop.f32.mrb[27].mxu1 }
 0x217   :  { %603 = vst.msk [vmem:[%s1498_s5 + $0x68] sm:$0xff] %vm88_vm1, %v532_v53 }
 0x218   :  { %v536_v55 = vpop.f32.mrb[28].mxu1 }
 0x219   :  { %v537_v56 = vadd.f32 %v1366_v14, %v536_v55  ;;  %v887_v57 = vpop.f32.mrb[29].mxu1 }
 0x21b   :  { %604 = vst.msk [vmem:[%s1498_s5 + $0x70] sm:$0xff] %vm88_vm1, %v537_v56 }
 0x21c   :  { %v541_v58 = vpop.f32.mrb[30].mxu1 }
 0x21d   :  { %v542_v59 = vadd.f32 %v1366_v14, %v541_v58  ;;  %v890_v60 = vpop.f32.mrb[31].mxu1 }
 0x21f   :  { %605 = vst.msk [vmem:[%s1498_s5 + $0x78] sm:$0xff] %vm88_vm1, %v542_v59 }
 0x220   :  { %v546_v61 = vpop.f32.mrb[32].mxu1 }
 0x221   :  { %v547_v62 = vadd.f32 %v1366_v14, %v546_v61  ;;  %v893_v63 = vpop.f32.mrb[33].mxu1 }
 0x223   :  { %606 = vst.msk [vmem:[%s1498_s5 + $0x80] sm:$0xff] %vm88_vm1, %v547_v62 }
 0x224   :  { %v551_v2 = vpop.f32.mrb[34].mxu1 }
 0x225   :  { %v552_v3 = vadd.f32 %v1366_v14, %v551_v2  ;;  %v896_v4 = vpop.f32.mrb[35].mxu1 }
 0x227   :  { %607 = vst.msk [vmem:[%s1498_s5 + $0x88] sm:$0xff] %vm88_vm1, %v552_v3 }
 0x228   :  { %v556_v5 = vpop.f32.mrb[36].mxu1 }
 0x229   :  { %v557_v6 = vadd.f32 %v1366_v14, %v556_v5  ;;  %v899_v7 = vpop.f32.mrb[37].mxu1 }
 0x22b   :  { %608 = vst.msk [vmem:[%s1498_s5 + $0x90] sm:$0xff] %vm88_vm1, %v557_v6 }
 0x22c   :  { %v561_v8 = vpop.f32.mrb[38].mxu1 }
 0x22d   :  { %v562_v9 = vadd.f32 %v1366_v14, %v561_v8  ;;  %v902_v10 = vpop.f32.mrb[39].mxu1 }
 0x22f   :  { %609 = vst.msk [vmem:[%s1498_s5 + $0x98] sm:$0xff] %vm88_vm1, %v562_v9 }
 0x230   :  { %v566_v11 = vpop.f32.mrb[40].mxu1 }
 0x231   :  { %v567_v12 = vadd.f32 %v1366_v14, %v566_v11  ;;  %v905_v13 = vpop.f32.mrb[41].mxu1 }
 0x233   :  { %610 = vst.msk [vmem:[%s1498_s5 + $0xa0] sm:$0xff] %vm88_vm1, %v567_v12 }
 0x234   :  { %v571_v15 = vpop.f32.mrb[42].mxu1 }
 0x235   :  { %v572_v16 = vadd.f32 %v1366_v14, %v571_v15  ;;  %v908_v17 = vpop.f32.mrb[43].mxu1 }
 0x237   :  { %611 = vst.msk [vmem:[%s1498_s5 + $0xa8] sm:$0xff] %vm88_vm1, %v572_v16 }
 0x238   :  { %v576_v37 = vpop.f32.mrb[44].mxu1 }
 0x239   :  { %v577_v18 = vadd.f32 %v1366_v14, %v576_v37  ;;  %v911_v1 = vpop.f32.mrb[45].mxu1 }
 0x23b   :  { %612 = vst.msk [vmem:[%s1498_s5 + $0xb0] sm:$0xff] %vm88_vm1, %v577_v18 }
 0x23c   :  { %v581_v0 = vpop.f32.mrb[46].mxu1 }
 0x23d   :  { %v582_v19 = vadd.f32 %v1366_v14, %v581_v0  ;;  %v914_v20 = vpop.f32.mrb[47].mxu1 }
 0x23f   :  { %613 = vst.msk [vmem:[%s1498_s5 + $0xb8] sm:$0xff] %vm88_vm1, %v582_v19 }
 0x240   :  { %v586_v21 = vpop.f32.mrb[48].mxu1 }
 0x241   :  { %v587_v22 = vadd.f32 %v1366_v14, %v586_v21  ;;  %v917_v23 = vpop.f32.mrb[49].mxu1 }
 0x243   :  { %614 = vst.msk [vmem:[%s1498_s5 + $0xc0] sm:$0xff] %vm88_vm1, %v587_v22 }
 0x244   :  { %619 = vsyncpa [#allocation4], 1 }

</bundles_post_ra>
